<compile_context>
chip_gen: v7x
topology: tpu7x:2x2x1
jax: 0.10.0
libtpu: 0.0.40
codegen_flags: <defaults>
</compile_context>

<pallas_src>
import jax
import jax.numpy as jnp
from jax.experimental import pallas as pl
from jax.experimental.pallas import tpu as pltpu


def _drop_path_kernel(x_ref, s_ref, o_ref):
    # x_ref: (TS, TC) tile of the (S, B*D) slab.
    # s_ref: (1, TC) resident pre-scaled keep mask (same dtype as x).
    # Pure broadcast multiply in the native dtype — no f32 round-trip.
    o_ref[...] = x_ref[...] * s_ref[...]


def _pick_block(S, BD, itemsize, target_bytes=2 << 20):
    """Choose an ~target_bytes (TS, TC) block.

    Each of the last two dims is either a multiple of (8, 128) or equals the
    full array extent; ragged edges are handled by the cdiv grid.
    """
    # Lane (last) dim: full width when it fits the budget, else a 128-multiple cap.
    max_cols = max(128, (target_bytes // (8 * itemsize) // 128) * 128)
    TC = BD if BD <= max_cols else max_cols
    # Sublane dim: fill the remaining budget with a multiple of 8 (or full S).
    max_rows = max(8, target_bytes // (TC * itemsize))
    TS = S if S <= max_rows else max(8, (min(S, max_rows) // 8) * 8)
    return TS, TC


def drop_path(x, drop_prob: float, training: bool, key):
    """JAX/Pallas equivalent of the PyTorch drop_path() for (S, B, D) inputs."""
    if drop_prob == 0.0 or not training:
        return x

    keep_prob = 1.0 - drop_prob
    S, B, D = x.shape
    BD = B * D

    # Per-sample Bernoulli(keep_prob), pre-scaled by 1/keep_prob in the wrapper
    # (B scalars -> negligible cost), cast to x.dtype, broadcast to a
    # lane-dense (1, B*D) row so the kernel is just one multiply.
    u = jax.random.uniform(key, (B,), dtype=jnp.float32)
    keep = (u < keep_prob).astype(jnp.float32)
    scale = keep / keep_prob if keep_prob > 0.0 else jnp.zeros_like(keep)
    scale_row = jnp.broadcast_to(
        scale.astype(x.dtype)[:, None], (B, D)).reshape(1, BD)

    # Free, contiguous 2-D view: (S, B, D) -> (S, B*D).
    x2d = x.reshape(S, BD)

    TS, TC = _pick_block(S, BD, x.dtype.itemsize)
    grid = (pl.cdiv(S, TS), pl.cdiv(BD, TC))

    out2d = pl.pallas_call(
        _drop_path_kernel,
        out_shape=jax.ShapeDtypeStruct((S, BD), x.dtype),
        grid=grid,
        in_specs=[
            pl.BlockSpec((TS, TC), lambda i, j: (i, j)),   # x tile (pipelined)
            pl.BlockSpec((1, TC), lambda i, j: (0, j)),    # resident scale row
        ],
        out_specs=pl.BlockSpec((TS, TC), lambda i, j: (i, j)),
        compiler_params=pltpu.CompilerParams(
            dimension_semantics=("parallel", "parallel")),
    )(x2d, scale_row)

    return out2d.reshape(S, B, D)


class DropPath:
    """Drop paths (Stochastic Depth) per sample."""

    def __init__(self, drop_prob=0.0):
        self.drop_prob = drop_prob
        self.training = True

    def __call__(self, x, key):
        return drop_path(x, self.drop_prob, self.training, key)


def _reference(x, drop_prob, key):
    """Pure-JAX reference using the same randoms as the kernel wrapper."""
    keep_prob = 1.0 - drop_prob
    S, B, D = x.shape
    u = jax.random.uniform(key, (B,), dtype=jnp.float32)
    keep = (u < keep_prob).astype(jnp.float32)
    scale = keep / keep_prob if keep_prob > 0.0 else jnp.zeros_like(keep)
    return x * scale.astype(x.dtype)[None, :, None]


if __name__ == "__main__":
    key = jax.random.PRNGKey(0)
    kx, kmask, kx2, kmask2 = jax.random.split(key, 4)

    # --- small shape implied by the module: (seq=8, batch=2, hidden=32) ---
    S, B, D = 8, 2, 32
    x = jax.random.normal(kx, (S, B, D), dtype=jnp.float32)

    module = DropPath(drop_prob=0.3)
    module.training = True
    out = jax.block_until_ready(module(x, kmask))
    ref = _reference(x, module.drop_prob, kmask)
    assert out.shape == x.shape and out.dtype == x.dtype
    assert jnp.allclose(out, ref, atol=1e-6), "small-shape mismatch vs reference"

    # eval / drop_prob==0 path is identity
    module.training = False
    assert jnp.array_equal(jax.block_until_ready(module(x, kmask)), x)
    module.training = True

    # --- larger bf16 shape to exercise the tiled, double-buffered grid ---
    S2, B2, D2 = 4096, 4, 256       # slab (4096, 1024) bf16 -> grid (4, 1)
    x2 = jax.random.normal(kx2, (S2, B2, D2), dtype=jnp.bfloat16)
    out2 = jax.block_until_ready(drop_path(x2, 0.25, True, kmask2))
    ref2 = _reference(x2, 0.25, kmask2)
    assert jnp.allclose(out2.astype(jnp.float32), ref2.astype(jnp.float32),
                        atol=1e-6), "large-shape mismatch vs reference"

    print("KERNEL_OK")
</pallas_src>

<mosaic_0001>
module attributes {stable_mosaic.version = 11 : i64} {
  func.func @_drop_path_kernel(%arg0: i32, %arg1: i32, %arg2: memref<8x64xf32, #tpu.memory_space<vmem>>, %arg3: memref<1x64xf32, #tpu.memory_space<vmem>>, %arg4: memref<8x64xf32, #tpu.memory_space<vmem>>) attributes {dimension_semantics = [#tpu.dimension_semantics<parallel>, #tpu.dimension_semantics<parallel>], iteration_bounds = array<i64: 1, 1>, scalar_prefetch = 0 : i64, scratch_operands = 0 : i64, tpu.core_type = #tpu.core_type<tc>, window_params = [{transform_indices = @transform_0, window_bounds = array<i64: 8, 64>}, {transform_indices = @transform_1, window_bounds = array<i64: 1, 64>}, {transform_indices = @transform_2, window_bounds = array<i64: 8, 64>}]} {
    %c0 = arith.constant 0 : index
    %c0_0 = arith.constant 0 : index
    %0 = vector.load %arg2[%c0, %c0_0] : memref<8x64xf32, #tpu.memory_space<vmem>>, vector<8x64xf32>
    %c0_1 = arith.constant 0 : index
    %c0_2 = arith.constant 0 : index
    %1 = vector.load %arg3[%c0_1, %c0_2] : memref<1x64xf32, #tpu.memory_space<vmem>>, vector<1x64xf32>
    %2 = vector.broadcast %1 : vector<1x64xf32> to vector<8x64xf32>
    %3 = arith.mulf %0, %2 : vector<8x64xf32>
    %c0_3 = arith.constant 0 : index
    %c0_4 = arith.constant 0 : index
    %4 = vector.load %arg4[%c0_3, %c0_4] : memref<8x64xf32, #tpu.memory_space<vmem>>, vector<8x64xf32>
    tpu.vector_store %arg4[%c0_3, %c0_4], %3 {strides = array<i32>} : memref<8x64xf32, #tpu.memory_space<vmem>>, vector<8x64xf32>,
    return
  }
  func.func @transform_0(%arg0: i32, %arg1: i32) -> (i32, i32) {
    %c0_i32 = arith.constant 0 : i32
    return %arg0, %arg1 : i32, i32
  }
  func.func @transform_1(%arg0: i32, %arg1: i32) -> (i32, i32) {
    %c0_i32 = arith.constant 0 : i32
    %c0_i32_0 = arith.constant 0 : i32
    return %c0_i32, %arg1 : i32, i32
  }
  func.func @transform_2(%arg0: i32, %arg1: i32) -> (i32, i32) {
    %c0_i32 = arith.constant 0 : i32
    return %arg0, %arg1 : i32, i32
  }
}

</mosaic_0001>

<bundles_post_ra>
// kernel: tpu_custom_call.1
= control target key start
LH: loop header
LB: loop body
LE: loop exit
PB: predicated region body
PF: predicated region fallthrough
CT: control target
= control target key end

     0   :  { %7 = vsyncpa [#allocation3], 0  ;;  %s145_s0 = inlined_call_operand.hbm [shape: f32[8,64], index: 0, kind: input, shape index: {}]   ;;  %s146_s1 = inlined_call_operand.vmem [shape: f32[1,64], index: 1, kind: input, shape index: {}]   ;;  %s147_s2 = inlined_call_operand.hbm [shape: f32[8,64], index: 2, kind: output, shape index: {}]  }
   0x1   :  { %8 = vsyncpa [#allocation4], 0  ;;  %s101_s9 = smov [#allocation2]   ;;  %s53_s13 = scalar_lea.hbm %s145_s0, 128 }
   0x2   :  { %s15_s10 = sshll.u32 %s101_s9, 4  ;;  %p54_p0 = scmp.ne.s32.totalorder %s145_s0, %s53_s13  ;;  %s16_s10 = int_to_ptr.vmem [resolvable:$true] %s15_s10 }
   0x3   :  { %p57_p1 = scmp.lt.u32.totalorder %s53_s13, %s145_s0 }
   0x5   :  { %p59_p2 = pnand %p57_p1, %p54_p0 }
   0x7   :  { %62 = shalt.err (!%p59_p2)
}
   0x8   :  { %s63_s18 = scalar_lea.vmem %s16_s10, 128  ;;  %p68_p4 = scmp.lt.s32.totalorder %s16_s10, %s16_s10 }
   0x9   :  { %p64_p3 = scmp.ne.s32.totalorder %s16_s10, %s63_s18  ;;  %p69_p5 = scmp.lt.s32.totalorder %s63_s18, %s63_s18 }
   0xb   :  { %p70_p6 = por %p69_p5, %p68_p4 }
   0xd   :  { %p71_p7 = pnand %p70_p6, %p64_p3 }
   0xf   :  { %74 = shalt.err (!%p71_p7)
}
  0x10   :  { %18 = dma.hbm_to_vmem [thread:$0]  %s145_s0, 128, %s16_s10, [#allocation3]  }
  0x11   :  { %97 = dma.done.wait [#allocation3], 128  }
  0x12   :  { %98 = vsyncadd [#allocation3], 4294967168  ;;  %s102_s21 = smov [#allocation5]   ;;  %v24_v0 = vld [vmem:[#allocation2] sm:$0xff]  ;;  %vm33_vm0 = vcmask 523264  }
  0x13   :  { %s41_s22 = sshll.u32 %s102_s21, 4  ;;  %v50_v1 = vld [vmem:[%s146_s1] ss:$0 sm:$0xff]  ;;  %s42_s22 = int_to_ptr.vmem [resolvable:$true] %s41_s22 }
  0x14   :  { %v32_v2 = vmul.f32 %v50_v1, %v24_v0  ;;  %s75_s25 = scalar_lea.vmem %s42_s22, 128  ;;  %p80_p9 = scmp.lt.s32.totalorder %s42_s22, %s42_s22 }
  0x15   :  { %p76_p8 = scmp.ne.s32.totalorder %s42_s22, %s75_s25  ;;  %p81_p10 = scmp.lt.s32.totalorder %s75_s25, %s75_s25 }
  0x16   :  { %34 = vst.msk [vmem:[#allocation5] sm:$0xff] %vm33_vm0, %v32_v2 }
  0x17   :  { %p82_p11 = por %p81_p10, %p80_p9 }
  0x19   :  { %p83_p12 = pnand %p82_p11, %p76_p8 }
  0x1b   :  { %86 = shalt.err (!%p83_p12)
}
  0x1c   :  { %s87_s27 = scalar_lea.hbm %s147_s2, 128 }
  0x1d   :  { %p88_p13 = scmp.ne.s32.totalorder %s147_s2, %s87_s27  ;;  %p91_p0 = scmp.lt.u32.totalorder %s87_s27, %s147_s2 }
  0x1f   :  { %p93_p1 = pnand %p91_p0, %p88_p13 }
  0x21   :  { %96 = shalt.err (!%p93_p1)
}
  0x22   :  { %44 = dma.vmem_to_hbm [thread:$0]  %s42_s22, 128, %s147_s2, [#allocation4]  }
  0x23   :  { %99 = dma.done.wait [#allocation4], 128  }
  0x24   :  { %100 = vsyncadd [#allocation4], 4294967168 }
  0x25   :  { %48 = vsyncpa [#allocation3], 1 }
  0x26   :  { %49 = vsyncpa [#allocation4], 1 }

</bundles_post_ra>
